<compile_context>
chip_gen: v6e
topology: v6e:2x2x1
jax: 0.10.0
libtpu: 0.0.40
codegen_flags: <defaults>
</compile_context>

<pallas_src>
import functools

import jax
import jax.numpy as jnp
from jax.experimental import pallas as pl
from jax.experimental.pallas import tpu as pltpu


# ---------------------------------------------------------------------------
# constants / helpers
# ---------------------------------------------------------------------------

_VMEM_LIMIT_BYTES = 48 * 1024 * 1024   # scoped VMEM limit: safe on v7x (64 MiB), raises v5e/v6e defaults
_VMEM_BLOCK_BUDGET = 36 * 1024 * 1024  # target for user-visible (double-buffered) blocks; leaves headroom


def _round_up(x, m):
    return (x + m - 1) // m * m


def _sublane(dtype):
    # sublane packing multiple per dtype width (f32:8, bf16:16, int8/fp8:32)
    return {4: 8, 2: 16, 1: 32}.get(jnp.dtype(dtype).itemsize, 8)


def _pick_tile(total, pref, unit):
    """Largest multiple of `unit` that is <= pref and divides `total` (total % unit == 0)."""
    pref = max(unit, min(pref, total))
    t = (pref // unit) * unit
    while total % t:
        t -= unit
    return t


# ---------------------------------------------------------------------------
# Pallas kernels
# ---------------------------------------------------------------------------

def _gap_kernel(x_ref, o_ref, *, inv_hw):
    """Global average pool one batch tile of an NCHW feature map.

    x_ref: (TB, C, HW) (NCHW, spatial flattened)   o_ref: (TB, C) f32
    Lane-axis reduce over HW in f32, scaled by 1/(H*W); C ends up on the lane axis.
    """
    o_ref[...] = jnp.sum(x_ref[...], axis=2, dtype=jnp.float32) * inv_hw


def _linear_kernel(f_ref, w_ref, b_ref, o_ref):
    """Classifier tile: (TB, K) @ (K, TN) + bias, bf16 MXU operands, f32 accumulation.

    f_ref: (TB, K) any float dtype     w_ref: (K, TN) bf16 (padded W^T)
    b_ref: (1, TN) f32                 o_ref: (TB, TN) f32
    """
    acc = jnp.dot(f_ref[...].astype(jnp.bfloat16), w_ref[...],
                  preferred_element_type=jnp.float32)
    o_ref[...] = acc + b_ref[...]


# ---------------------------------------------------------------------------
# Wrapper (parameters + pallas_call glue)
# ---------------------------------------------------------------------------

class BNNetworkPallas:
    """JAX/Pallas re-implementation of BBN's BNNetwork (mode='ResNet50' -> GAP module)."""

    def __init__(self, num_classes=16, num_features=32, mode="ResNet50", key=None,
                 b_tile=256, n_tile=512):
        assert num_features % 2 == 0, "separate_classifier requires even num_features"
        self.num_classes = num_classes
        self.num_features = num_features
        self.mode = mode
        self._b_tile_pref = b_tile
        self._n_tile_pref = n_tile

        if key is None:
            key = jax.random.PRNGKey(0)
        kw, kb = jax.random.split(key)
        # PyTorch nn.Linear default init: U(-1/sqrt(in), 1/sqrt(in))
        bound = 1.0 / (num_features ** 0.5)
        self.weight = jax.random.uniform(
            kw, (num_classes, num_features), jnp.float32, -bound, bound)   # (N, F) like torch
        self.bias = jax.random.uniform(kb, (num_classes,), jnp.float32, -bound, bound)

        # --- cached, padded parameter views (built once, reused every call) ---
        n, f = num_classes, num_features
        n_pad = _round_up(n, 128)                       # lane-dense output columns
        self._n_pad = n_pad
        w_t = self.weight.T                             # (F, N)
        # bf16 weights for the MXU (halves weight DMA bytes / VMEM footprint); f32 bias.
        self._w_t_bf16 = (jnp.zeros((f, n_pad), jnp.bfloat16)
                          .at[:, :n].set(w_t.astype(jnp.bfloat16)))
        self._b_pad = jnp.zeros((1, n_pad), jnp.float32).at[0, :n].set(self.bias)

        # Dense half-K weights for separate_classifier (no zero-padded block diagonal).
        half = f // 2
        self._w_c_bf16 = self._w_t_bf16[:half]          # (F/2, n_pad)
        self._w_b_bf16 = self._w_t_bf16[half:]          # (F/2, n_pad)
        self._b_half = 0.5 * self._b_pad

        # jit the forward paths: pad + pallas_call(s) + final slice become one dispatch.
        self._fwd = jax.jit(self._forward_impl)
        self._cls = jax.jit(self._classifier_impl)
        self._sep = jax.jit(self._separate_impl)

    # ------------------------------------------------------------------ utils

    def _pad_batch(self, a):
        b = a.shape[0]
        sub = _sublane(a.dtype)
        b_pad = _round_up(max(b, sub), sub)
        if b_pad != b:
            a = jnp.pad(a, ((0, b_pad - b),) + ((0, 0),) * (a.ndim - 1))
        return a

    # ------------------------------------------------------------ GAP kernel

    def _gap_pool(self, x_nchw):
        """(B_pad, C, H, W) -> (B_pad, C) f32 mean over H, W (NCHW consumed directly)."""
        b_pad, c, h, w = x_nchw.shape
        hw = h * w
        x3 = x_nchw.reshape(b_pad, c, hw)               # free reshape (trailing dims)

        # VMEM budget: x block (tb, C, HW) + pooled out (tb, C) f32, double-buffered.
        row_bytes = 2 * (c * hw * jnp.dtype(x3.dtype).itemsize + c * 4)
        sub = 8                                         # f32 pooled output
        tb_cap = max(sub, (_VMEM_BLOCK_BUDGET // row_bytes) // sub * sub)
        tb = _pick_tile(b_pad, min(self._b_tile_pref, tb_cap), sub)

        kernel = functools.partial(_gap_kernel, inv_hw=1.0 / hw)
        return pl.pallas_call(
            kernel,
            out_shape=jax.ShapeDtypeStruct((b_pad, c), jnp.float32),
            grid_spec=pltpu.PrefetchScalarGridSpec(
                num_scalar_prefetch=0,
                grid=(b_pad // tb,),
                in_specs=[pl.BlockSpec((tb, c, hw), lambda i: (i, 0, 0))],
                out_specs=pl.BlockSpec((tb, c), lambda i: (i, 0)),
            ),
            compiler_params=pltpu.CompilerParams(
                dimension_semantics=("parallel",),
                vmem_limit_bytes=_VMEM_LIMIT_BYTES),
        )(x3)

    # ------------------------------------------------------- classifier kernel

    def _tiled_linear(self, feats, w, b):
        """feats:(B_pad, K) @ w:(K, Ncols) bf16 + b:(1, Ncols) f32 -> (B_pad, Ncols) f32.

        Grid = (class tiles, batch tiles) with batch fastest so the weight slab stays
        VMEM-resident across batch tiles (streamed from HBM once per class tile).
        """
        b_pad, k = feats.shape
        n_cols = w.shape[1]
        f_item = jnp.dtype(feats.dtype).itemsize
        sub = _sublane(feats.dtype)

        # class tile: weight slab (K, tn) bf16, double-buffered, within ~1/3 of the budget
        tn_cap = max(128, ((_VMEM_BLOCK_BUDGET // 3) // (2 * k * 2)) // 128 * 128)
        tn = _pick_tile(n_cols, min(self._n_tile_pref, tn_cap), 128)

        # batch tile: activation (tb, K) + output (tb, tn) f32, double-buffered
        row_bytes = 2 * (k * f_item + tn * 4)
        tb_cap = max(sub, ((_VMEM_BLOCK_BUDGET // 2) // row_bytes) // sub * sub)
        tb = _pick_tile(b_pad, min(self._b_tile_pref, tb_cap), sub)

        grid = (n_cols // tn, b_pad // tb)              # batch axis fastest
        return pl.pallas_call(
            _linear_kernel,
            out_shape=jax.ShapeDtypeStruct((b_pad, n_cols), jnp.float32),
            grid_spec=pltpu.PrefetchScalarGridSpec(
                num_scalar_prefetch=0,
                grid=grid,
                in_specs=[
                    pl.BlockSpec((tb, k), lambda j, i: (i, 0)),
                    pl.BlockSpec((k, tn), lambda j, i: (0, j)),   # resident across batch tiles
                    pl.BlockSpec((1, tn), lambda j, i: (0, j)),
                ],
                out_specs=pl.BlockSpec((tb, tn), lambda j, i: (i, j)),
            ),
            compiler_params=pltpu.CompilerParams(
                dimension_semantics=("parallel", "parallel"),
                vmem_limit_bytes=_VMEM_LIMIT_BYTES),
        )(feats, w, b)

    # --------------------------------------------------------- jitted impls

    def _forward_impl(self, x, w, b):
        B, C, H, W = x.shape
        assert C == self.num_features
        x = self._pad_batch(x)
        pooled = self._gap_pool(x)                       # (B_pad, C) f32
        out = self._tiled_linear(pooled, w, b)           # (B_pad, n_pad) f32
        return out[:B, :self.num_classes]

    def _classifier_impl(self, feats, w, b):
        B = feats.shape[0]
        assert feats.shape[1] == self.num_features
        f = self._pad_batch(feats)
        out = self._tiled_linear(f, w, b)
        return out[:B, :self.num_classes]

    def _separate_impl(self, fcfb, wc, wb, bh):
        B = fcfb.shape[0]
        assert fcfb.shape[1] == self.num_features
        half = self.num_features // 2
        f = self._pad_batch(fcfb)
        o_c = self._tiled_linear(f[:, :half], wc, bh)    # dense half-K matmuls
        o_b = self._tiled_linear(f[:, half:], wb, bh)
        n = self.num_classes
        return o_c[:B, :n], o_b[:B, :n]

    # ------------------------------------------------------------ public API

    def __call__(self, x):
        """Default forward: GAP + flatten + classifier."""
        return self._fwd(x, self._w_t_bf16, self._b_pad)

    def classifier(self, feats):
        """forward(..., classifier_flag=True)."""
        return self._cls(feats, self._w_t_bf16, self._b_pad)

    def separate_classifier(self, fcfb):
        """forward(..., separate_classifier_flag=True)."""
        return self._sep(fcfb, self._w_c_bf16, self._w_b_bf16, self._b_half)


# ---------------------------------------------------------------------------
# Main
# ---------------------------------------------------------------------------

if __name__ == "__main__":
    key = jax.random.PRNGKey(0)
    k_x, k_f, k_params = jax.random.split(key, 3)

    B, C, H, W = 2, 32, 8, 8          # backbone feature map (NCHW), C == num_features
    NUM_CLASSES = 16

    net = BNNetworkPallas(num_classes=NUM_CLASSES, num_features=C, key=k_params)

    x = jax.random.normal(k_x, (B, C, H, W), jnp.float32)

    # default forward: GAP + flatten + classifier (Pallas GAP kernel + Pallas matmul kernel)
    logits = jax.block_until_ready(net(x))

    # pure-JAX reference checks (bf16 MXU operands -> relaxed tolerances)
    pooled_ref = x.mean(axis=(2, 3))                       # (B, C)
    logits_ref = pooled_ref @ net.weight.T + net.bias
    assert logits.shape == (B, NUM_CLASSES)
    assert jnp.allclose(logits, logits_ref, atol=1e-2, rtol=1e-2)

    # classifier_flag path
    feats = jax.random.normal(k_f, (B, C), jnp.float32)
    out_cls = jax.block_until_ready(net.classifier(feats))
    assert jnp.allclose(out_cls, feats @ net.weight.T + net.bias, atol=2e-2, rtol=2e-2)

    # separate_classifier path
    o_c, o_b = net.separate_classifier(feats)
    jax.block_until_ready((o_c, o_b))
    half = C // 2
    ref_c = feats[:, :half] @ net.weight[:, :half].T + 0.5 * net.bias
    ref_b = feats[:, half:] @ net.weight[:, half:].T + 0.5 * net.bias
    assert jnp.allclose(o_c, ref_c, atol=2e-2, rtol=2e-2)
    assert jnp.allclose(o_b, ref_b, atol=2e-2, rtol=2e-2)

    print("KERNEL_OK")
</pallas_src>

<mosaic_0001>
module attributes {stable_mosaic.version = 11 : i64} {
  func.func @_gap_kernel(%arg0: i32, %arg1: memref<8x32x64xf32, #tpu.memory_space<vmem>>, %arg2: memref<8x32xf32, #tpu.memory_space<vmem>>) attributes {dimension_semantics = [#tpu.dimension_semantics<parallel>], iteration_bounds = array<i64: 1>, scalar_prefetch = 0 : i64, scratch_operands = 0 : i64, tpu.core_type = #tpu.core_type<tc>, window_params = [{transform_indices = @transform_0, window_bounds = array<i64: 8, 32, 64>}, {transform_indices = @transform_1, window_bounds = array<i64: 8, 32>}]} {
    %c0 = arith.constant 0 : index
    %c0_0 = arith.constant 0 : index
    %c0_1 = arith.constant 0 : index
    %0 = vector.load %arg1[%c0, %c0_0, %c0_1] : memref<8x32x64xf32, #tpu.memory_space<vmem>>, vector<8x32x64xf32>
    %cst = arith.constant dense<0.000000e+00> : vector<8x32xf32>
    %1 = vector.multi_reduction <add>, %0, %cst [2] : vector<8x32x64xf32> to vector<8x32xf32>
    %cst_2 = arith.constant 1.562500e-02 : f32
    %2 = vector.broadcast %cst_2 : f32 to vector<8x32xf32>
    %3 = arith.mulf %1, %2 : vector<8x32xf32>
    %c0_3 = arith.constant 0 : index
    %c0_4 = arith.constant 0 : index
    %4 = vector.load %arg2[%c0_3, %c0_4] : memref<8x32xf32, #tpu.memory_space<vmem>>, vector<8x32xf32>
    tpu.vector_store %arg2[%c0_3, %c0_4], %3 {strides = array<i32>} : memref<8x32xf32, #tpu.memory_space<vmem>>, vector<8x32xf32>,
    return
  }
  func.func @transform_0(%arg0: i32) -> (i32, i32, i32) {
    %c0_i32 = arith.constant 0 : i32
    %c0_i32_0 = arith.constant 0 : i32
    %c0_i32_1 = arith.constant 0 : i32
    return %arg0, %c0_i32, %c0_i32_0 : i32, i32, i32
  }
  func.func @transform_1(%arg0: i32) -> (i32, i32) {
    %c0_i32 = arith.constant 0 : i32
    %c0_i32_0 = arith.constant 0 : i32
    return %arg0, %c0_i32 : i32, i32
  }
}

module attributes {stable_mosaic.version = 11 : i64} {
  func.func @_linear_kernel(%arg0: i32, %arg1: i32, %arg2: memref<8x32xf32, #tpu.memory_space<vmem>>, %arg3: memref<32x128xbf16, #tpu.memory_space<vmem>>, %arg4: memref<1x128xf32, #tpu.memory_space<vmem>>, %arg5: memref<8x128xf32, #tpu.memory_space<vmem>>) attributes {dimension_semantics = [#tpu.dimension_semantics<parallel>, #tpu.dimension_semantics<parallel>], iteration_bounds = array<i64: 1, 1>, scalar_prefetch = 0 : i64, scratch_operands = 0 : i64, tpu.core_type = #tpu.core_type<tc>, window_params = [{transform_indices = @transform_0, window_bounds = array<i64: 8, 32>}, {transform_indices = @transform_1, window_bounds = array<i64: 32, 128>}, {transform_indices = @transform_2, window_bounds = array<i64: 1, 128>}, {transform_indices = @transform_3, window_bounds = array<i64: 8, 128>}]} {
    %c0 = arith.constant 0 : index
    %c0_0 = arith.constant 0 : index
    %0 = vector.load %arg2[%c0, %c0_0] : memref<8x32xf32, #tpu.memory_space<vmem>>, vector<8x32xf32>
    %1 = arith.truncf %0 : vector<8x32xf32> to vector<8x32xbf16>
    %c0_1 = arith.constant 0 : index
    %c0_2 = arith.constant 0 : index
    %2 = vector.load %arg3[%c0_1, %c0_2] : memref<32x128xbf16, #tpu.memory_space<vmem>>, vector<32x128xbf16>
    %cst = arith.constant dense<0.000000e+00> : vector<8x128xf32>
    %3 = tpu.matmul %1, %2, %cst {dimension_numbers = #tpu.dot_dimension_numbers<[1], [0], [0], [1], [0, 0, 1, 1], [], []>} : vector<8x32xbf16>, vector<32x128xbf16>, vector<8x128xf32> -> vector<8x128xf32>
    %c0_3 = arith.constant 0 : index
    %c0_4 = arith.constant 0 : index
    %4 = vector.load %arg4[%c0_3, %c0_4] : memref<1x128xf32, #tpu.memory_space<vmem>>, vector<1x128xf32>
    %5 = vector.broadcast %4 : vector<1x128xf32> to vector<8x128xf32>
    %6 = arith.addf %3, %5 : vector<8x128xf32>
    %c0_5 = arith.constant 0 : index
    %c0_6 = arith.constant 0 : index
    %7 = vector.load %arg5[%c0_5, %c0_6] : memref<8x128xf32, #tpu.memory_space<vmem>>, vector<8x128xf32>
    tpu.vector_store %arg5[%c0_5, %c0_6], %6 {strides = array<i32>} : memref<8x128xf32, #tpu.memory_space<vmem>>, vector<8x128xf32>,
    return
  }
  func.func @transform_0(%arg0: i32, %arg1: i32) -> (i32, i32) {
    %c0_i32 = arith.constant 0 : i32
    %c0_i32_0 = arith.constant 0 : i32
    return %arg1, %c0_i32 : i32, i32
  }
  func.func @transform_1(%arg0: i32, %arg1: i32) -> (i32, i32) {
    %c0_i32 = arith.constant 0 : i32
    %c0_i32_0 = arith.constant 0 : i32
    return %c0_i32, %arg0 : i32, i32
  }
  func.func @transform_2(%arg0: i32, %arg1: i32) -> (i32, i32) {
    %c0_i32 = arith.constant 0 : i32
    %c0_i32_0 = arith.constant 0 : i32
    return %c0_i32, %arg0 : i32, i32
  }
  func.func @transform_3(%arg0: i32, %arg1: i32) -> (i32, i32) {
    %c0_i32 = arith.constant 0 : i32
    return %arg1, %arg0 : i32, i32
  }
}

</mosaic_0001>

<bundles_post_ra>
// kernel: _forward_impl.3
= control target key start
LH: loop header
LB: loop body
LE: loop exit
PB: predicated region body
PF: predicated region fallthrough
CT: control target
= control target key end

     0   :  { %v108_v0 = vmov 0.0   ;;  %vm109_vm0 = vmmov 0   ;;  %vm40_vm1 = vcmask 261120   ;;  %s145_s1 = inlined_call_operand.vmem [shape: bf16[32,128], index: 1, kind: input, shape index: {}]   ;;  %s146_s0 = inlined_call_operand.vmem [shape: f32[8,32], index: 0, kind: input, shape index: {}]   ;;  %s147_s2 = inlined_call_operand.vmem [shape: f32[1,128], index: 2, kind: input, shape index: {}]   ;;  %s148_s3 = inlined_call_operand.vmem [shape: f32[8,128], index: 3, kind: output, shape index: {}]  }
   0x1   :  { %96 = vmatprep.subr.bf16.mxu0 %v108_v0  ;;  %v106_v1 = vld [vmem:[%s145_s1 + $0x8] sm:$0xff]   ;;  %100 = vmatprep.mubr.msk.bf16.mxu0 %vm109_vm0, %v108_v0  ;;  %v107_v2 = vld [vmem:[%s145_s1] sm:$0xff]  }
   0x2   :  { %97 = vmatpush3.bf16.msra.mxu0 %v106_v1  ;;  %v15_v3 = vld [vmem:[%s146_s0] sm:$0xff] }
   0x3   :  { %98 = vmatprep.subr.bf16.mxu0 %v108_v0  ;;  %v16_v4 = vpack.c.bf16 %v15_v3, %v15_v3  ;;  %v89_v5 = vld [vmem:[%s147_s2] ss:$0 sm:$0xff] }
   0x6   :  { %99 = vmatpush3.bf16.msra.mxu0 %v107_v2 }
   0x9   :  { %101 = vmatmul.mubr.msk.bf16.vlgmr.msra.gmra.mxu0 %vm40_vm1, %v16_v4 }
  0xc9   :  { %v78_v6 = vpop.f32.mrf.mxu0 }
  0xca   :  { %v79_v7 = vadd.f32 %v89_v5, %v78_v6 }
  0xcb   :  { %v102_v8 = vpop.f32.mrf.mxu0 }
  0xcc   :  { %84 = vst [vmem:[%s148_s3] sm:$0xff] %v79_v7 }
  0xcd   :  { %v81_v9 = vpop.f32.mrf.mxu0 }
  0xcf   :  { %v103_v10 = vpop.f32.mrf.mxu0 }

// kernel: _forward_impl.2
= control target key start
LH: loop header
LB: loop body
LE: loop exit
PB: predicated region body
PF: predicated region fallthrough
CT: control target
= control target key end

     0   :  { %vm40_vm0 = vcmask 523264   ;;  %vm212_vm1 = vcmask 130112   ;;  %vm219_vm2 = vcmask 195712   ;;  %vm226_vm3 = vcmask 261312   ;;  %s599_s0 = inlined_call_operand.vmem [shape: f32[8,32,64], index: 0, kind: input, shape index: {}]   ;;  %s600_s1 = inlined_call_operand.vmem [shape: f32[8,32], index: 1, kind: output, shape index: {}]  }
   0x1   :  { %v12_v0 = vld [vmem:[%s599_s0 + $0x20] sm:$0xff]  ;;  %v13_v2 = vld [vmem:[%s599_s0 + $0x28] sm:$0xff]  ;;  %v14_v8 = vld [vmem:[%s599_s0 + $0x30] sm:$0xff]  ;;  %vm361_vm4 = vcmask 1041409   ;;  %vm363_vm5 = vcmask 1042434   ;;  %vm365_vm6 = vcmask 1043459  }
   0x2   :  { %v8_v1 = vld [vmem:[%s599_s0] sm:$0xff]  ;;  %v53_v3 = vsel %vm40_vm0, %v12_v0, 0.0  ;;  %v9_v5 = vld [vmem:[%s599_s0 + $0x8] sm:$0xff]  ;;  %v56_v6 = vsel %vm40_vm0, %v13_v2, 0.0  ;;  %v10_v9 = vld [vmem:[%s599_s0 + $0x10] sm:$0xff]  ;;  %v59_v10 = vsel %vm40_vm0, %v14_v8, 0.0 }
   0x3   :  { %v41_v4 = vsel %vm40_vm0, %v8_v1, 0.0  ;;  %54 = vadd.xlane.f32.xlu1 %v53_v3  ;;  %v44_v7 = vsel %vm40_vm0, %v9_v5, 0.0  ;;  %v47_v11 = vsel %vm40_vm0, %v10_v9, 0.0  ;;  %v17_v12 = vld [vmem:[%s599_s0 + $0x48] sm:$0xff]  ;;  %v16_v13 = vld [vmem:[%s599_s0 + $0x40] sm:$0xff]  ;;  %v15_v16 = vld [vmem:[%s599_s0 + $0x38] sm:$0xff] }
   0x4   :  { %42 = vadd.xlane.f32.xlu0 %v41_v4  ;;  %v68_v14 = vsel %vm40_vm0, %v17_v12, 0.0  ;;  %v65_v15 = vsel %vm40_vm0, %v16_v13, 0.0  ;;  %v11_v17 = vld [vmem:[%s599_s0 + $0x18] sm:$0xff]  ;;  %v62_v18 = vsel %vm40_vm0, %v15_v16, 0.0  ;;  %v20_v20 = vld [vmem:[%s599_s0 + $0x60] sm:$0xff]  ;;  %v18_v21 = vld [vmem:[%s599_s0 + $0x50] sm:$0xff] }
   0x5   :  { %v50_v19 = vsel %vm40_vm0, %v11_v17, 0.0  ;;  %v77_v22 = vsel %vm40_vm0, %v20_v20, 0.0  ;;  %v71_v23 = vsel %vm40_vm0, %v18_v21, 0.0  ;;  %v19_v24 = vld [vmem:[%s599_s0 + $0x58] sm:$0xff]  ;;  %v21_v25 = vld [vmem:[%s599_s0 + $0x68] sm:$0xff]  ;;  %v24_v28 = vld [vmem:[%s599_s0 + $0x80] sm:$0xff] }
   0x6   :  { %v74_v26 = vsel %vm40_vm0, %v19_v24, 0.0  ;;  %v80_v27 = vsel %vm40_vm0, %v21_v25, 0.0  ;;  %v22_v29 = vld [vmem:[%s599_s0 + $0x70] sm:$0xff]  ;;  %v89_v30 = vsel %vm40_vm0, %v24_v28, 0.0  ;;  %v23_v32 = vld [vmem:[%s599_s0 + $0x78] sm:$0xff]  ;;  %v25_v33 = vld [vmem:[%s599_s0 + $0x88] sm:$0xff] }
   0x7   :  { %57 = vadd.xlane.f32.xlu1 %v56_v6  ;;  %v83_v31 = vsel %vm40_vm0, %v22_v29, 0.0  ;;  %v86_v34 = vsel %vm40_vm0, %v23_v32, 0.0  ;;  %v92_v35 = vsel %vm40_vm0, %v25_v33, 0.0  ;;  %v28_v36 = vld [vmem:[%s599_s0 + $0xa0] sm:$0xff]  ;;  %v26_v37 = vld [vmem:[%s599_s0 + $0x90] sm:$0xff]  ;;  %v27_v40 = vld [vmem:[%s599_s0 + $0x98] sm:$0xff] }
   0x8   :  { %45 = vadd.xlane.f32.xlu0 %v44_v7  ;;  %v101_v38 = vsel %vm40_vm0, %v28_v36, 0.0  ;;  %v95_v39 = vsel %vm40_vm0, %v26_v37, 0.0  ;;  %v29_v41 = vld [vmem:[%s599_s0 + $0xa8] sm:$0xff]  ;;  %v98_v42 = vsel %vm40_vm0, %v27_v40, 0.0  ;;  %v32_v44 = vld [vmem:[%s599_s0 + $0xc0] sm:$0xff]  ;;  %v30_v45 = vld [vmem:[%s599_s0 + $0xb0] sm:$0xff] }
   0x9   :  { %v104_v43 = vsel %vm40_vm0, %v29_v41, 0.0  ;;  %v113_v46 = vsel %vm40_vm0, %v32_v44, 0.0  ;;  %v107_v47 = vsel %vm40_vm0, %v30_v45, 0.0  ;;  %v31_v48 = vld [vmem:[%s599_s0 + $0xb8] sm:$0xff]  ;;  %v33_v49 = vld [vmem:[%s599_s0 + $0xc8] sm:$0xff]  ;;  %v36_v52 = vld [vmem:[%s599_s0 + $0xe0] sm:$0xff] }
   0xa   :  { %v110_v50 = vsel %vm40_vm0, %v31_v48, 0.0  ;;  %v116_v51 = vsel %vm40_vm0, %v33_v49, 0.0  ;;  %v34_v53 = vld [vmem:[%s599_s0 + $0xd0] sm:$0xff]  ;;  %v125_v54 = vsel %vm40_vm0, %v36_v52, 0.0  ;;  %v35_v56 = vld [vmem:[%s599_s0 + $0xd8] sm:$0xff]  ;;  %v37_v57 = vld [vmem:[%s599_s0 + $0xe8] sm:$0xff] }
   0xb   :  { %60 = vadd.xlane.f32.xlu1 %v59_v10  ;;  %v119_v55 = vsel %vm40_vm0, %v34_v53, 0.0  ;;  %v122_v58 = vsel %vm40_vm0, %v35_v56, 0.0  ;;  %v128_v59 = vsel %vm40_vm0, %v37_v57, 0.0  ;;  %v38_v60 = vld [vmem:[%s599_s0 + $0xf0] sm:$0xff]  ;;  %v39_v61 = vld [vmem:[%s599_s0 + $0xf8] sm:$0xff]  ;;  %vm367_vm7 = vcmask 1044484  }
   0xc   :  { %48 = vadd.xlane.f32.xlu0 %v47_v11  ;;  %v131_v62 = vsel %vm40_vm0, %v38_v60, 0.0  ;;  %v134_v63 = vsel %vm40_vm0, %v39_v61, 0.0  ;;  %vm369_vm8 = vcmask 1045509   ;;  %vm371_vm9 = vcmask 1046534  }
   0xd   :  { %vm373_vm10 = vcmask 1047559   ;;  %vm376_vm11 = vcmask 261120  }
   0xf   :  { %69 = vadd.xlane.f32.xlu1 %v68_v14  ;;  %v201_v14 = vlaneseq }
  0x10   :  { %66 = vadd.xlane.f32.xlu0 %v65_v15 }
  0x11   :  { %v202_v17 = vand.u32 127, %v201_v14 }
  0x13   :  { %63 = vadd.xlane.f32.xlu1 %v62_v18  ;;  %v204_v18 = vshrl.u32 %v201_v14, 7  ;;  %v207_v21 = vadd.s32 4294967288, %v202_v17 }
  0x14   :  { %51 = vadd.xlane.f32.xlu0 %v50_v19 }
  0x15   :  { %v522_v24 = vsub.s32 %v202_v17, %v204_v18  ;;  %v526_v28 = vsub.s32 %v207_v21, %v204_v18 }
  0x17   :  { %78 = vadd.xlane.f32.xlu1 %v77_v22  ;;  %v214_v22 = vadd.s32 4294967280, %v202_v17 }
  0x18   :  { %72 = vadd.xlane.f32.xlu0 %v71_v23  ;;  %v221_v23 = vadd.s32 4294967272, %v202_v17 }
  0x1b   :  { %75 = vadd.xlane.f32.xlu1 %v74_v26 }
  0x1c   :  { %81 = vadd.xlane.f32.xlu0 %v80_v27 }
  0x1f   :  { %90 = vadd.xlane.f32.xlu1 %v89_v30 }
  0x20   :  { %84 = vadd.xlane.f32.xlu0 %v83_v31  ;;  %v528_v31 = vsub.s32 %v214_v22, %v204_v18 }
  0x23   :  { %87 = vadd.xlane.f32.xlu1 %v86_v34 }
  0x24   :  { %93 = vadd.xlane.f32.xlu0 %v92_v35  ;;  %v530_v35 = vsub.s32 %v221_v23, %v204_v18 }
  0x27   :  { %102 = vadd.xlane.f32.xlu1 %v101_v38 }
  0x28   :  { %96 = vadd.xlane.f32.xlu0 %v95_v39 }
  0x2b   :  { %99 = vadd.xlane.f32.xlu1 %v98_v42 }
  0x2c   :  { %105 = vadd.xlane.f32.xlu0 %v104_v43 }
  0x2f   :  { %114 = vadd.xlane.f32.xlu1 %v113_v46 }
  0x30   :  { %108 = vadd.xlane.f32.xlu0 %v107_v47 }
  0x33   :  { %111 = vadd.xlane.f32.xlu1 %v110_v50 }
  0x34   :  { %117 = vadd.xlane.f32.xlu0 %v116_v51 }
  0x37   :  { %126 = vadd.xlane.f32.xlu1 %v125_v54 }
  0x38   :  { %120 = vadd.xlane.f32.xlu0 %v119_v55 }
  0x3b   :  { %123 = vadd.xlane.f32.xlu1 %v122_v58 }
  0x3c   :  { %129 = vadd.xlane.f32.xlu0 %v128_v59 }
  0x3f   :  { %135 = vadd.xlane.f32.xlu1 %v134_v63 }
  0x40   :  { %132 = vadd.xlane.f32.xlu0 %v131_v62 }
  0x8c   :  { %v55_v0 = vpop.xlane.xlu1 %54 }
  0x8d   :  { %v43_v1 = vpop.xlane.xlu0 %42  ;;  %v141_v27 = vmul.f32 0.015625, %v55_v0 }
  0x8e   :  { %v137_v34 = vmul.f32 0.015625, %v43_v1 }
  0x8f   :  { %v231_v40 = vrot.slane %v141_v27, %v522_v24 }
  0x90   :  { %v58_v2 = vpop.xlane.xlu1 %57  ;;  %v206_v47 = vrot.slane %v137_v34, %v522_v24 }
  0x91   :  { %v46_v3 = vpop.xlane.xlu0 %45  ;;  %v142_v29 = vmul.f32 0.015625, %v58_v2 }
  0x92   :  { %v138_v30 = vmul.f32 0.015625, %v46_v3 }
  0x93   :  { %v235_v41 = vrot.slane %v142_v29, %v526_v28 }
  0x94   :  { %v61_v4 = vpop.xlane.xlu1 %60  ;;  %v211_v42 = vrot.slane %v138_v30, %v526_v28 }
  0x95   :  { %v49_v5 = vpop.xlane.xlu0 %48  ;;  %v143_v32 = vmul.f32 0.015625, %v61_v4  ;;  %v236_v53 = vsel %vm212_vm1, %v235_v41, %v231_v40 }
  0x96   :  { %v139_v33 = vmul.f32 0.015625, %v49_v5  ;;  %v213_v54 = vsel %vm212_vm1, %v211_v42, %v206_v47 }
  0x97   :  { %v240_v43 = vrot.slane %v143_v32, %v528_v31 }
  0x98   :  { %v70_v6 = vpop.xlane.xlu1 %69  ;;  %v218_v44 = vrot.slane %v139_v33, %v528_v31 }
  0x99   :  { %v67_v7 = vpop.xlane.xlu0 %66  ;;  %v146_v45 = vmul.f32 0.015625, %v70_v6  ;;  %v241_v56 = vsel %vm219_vm2, %v240_v43, %v236_v53 }
  0x9a   :  { %v145_v46 = vmul.f32 0.015625, %v67_v7  ;;  %v220_v57 = vsel %vm219_vm2, %v218_v44, %v213_v54 }
  0x9b   :  { %v254_v58 = vrot.slane %v146_v45, %v526_v28 }
  0x9c   :  { %v64_v8 = vpop.xlane.xlu1 %63  ;;  %v250_v59 = vrot.slane %v145_v46, %v522_v24 }
  0x9d   :  { %v52_v9 = vpop.xlane.xlu0 %51  ;;  %v144_v36 = vmul.f32 0.015625, %v64_v8 }
  0x9e   :  { %v140_v37 = vmul.f32 0.015625, %v52_v9  ;;  %v255_v5 = vsel %vm212_vm1, %v254_v58, %v250_v59 }
  0x9f   :  { %v245_v48 = vrot.slane %v144_v36, %v530_v35 }
  0xa0   :  { %v79_v10 = vpop.xlane.xlu1 %78  ;;  %v225_v49 = vrot.slane %v140_v37, %v530_v35 }
  0xa1   :  { %v73_v11 = vpop.xlane.xlu0 %72  ;;  %v246_v60 = vsel %vm226_vm3, %v245_v48, %v241_v56  ;;  %v149_v3 = vmul.f32 0.015625, %v79_v10 }
  0xa2   :  { %v147_v50 = vmul.f32 0.015625, %v73_v11  ;;  %v227_v61 = vsel %vm226_vm3, %v225_v49, %v220_v57 }
  0xa3   :  { %v362_v6 = vsel %vm361_vm4, %v246_v60, %v227_v61  ;;  %v269_v21 = vrot.slane %v149_v3, %v522_v24 }
  0xa4   :  { %v76_v12 = vpop.xlane.xlu1 %75  ;;  %v259_v62 = vrot.slane %v147_v50, %v528_v31 }
  0xa5   :  { %v82_v13 = vpop.xlane.xlu0 %81  ;;  %v148_v55 = vmul.f32 0.015625, %v76_v12 }
  0xa6   :  { %v150_v63 = vmul.f32 0.015625, %v82_v13  ;;  %v260_v8 = vsel %vm219_vm2, %v259_v62, %v255_v5 }
  0xa7   :  { %v264_v4 = vrot.slane %v148_v55, %v530_v35 }
  0xa8   :  { %v91_v15 = vpop.xlane.xlu1 %90  ;;  %v273_v9 = vrot.slane %v150_v63, %v526_v28 }
  0xa9   :  { %v520_v16 = vpop.xlane.xlu0 %84  ;;  %v153_v7 = vmul.f32 0.015625, %v91_v15  ;;  %v265_v15 = vsel %vm226_vm3, %v264_v4, %v260_v8 }
  0xaa   :  { %v151_v11 = vmul.f32 0.015625, %v520_v16  ;;  %v274_v29 = vsel %vm212_vm1, %v273_v9, %v269_v21  ;;  %v364_v62 = vsel %vm363_vm5, %v265_v15, %v362_v6 }
  0xab   :  { %v288_v27 = vrot.slane %v153_v7, %v522_v24 }
  0xac   :  { %v88_v19 = vpop.xlane.xlu1 %87  ;;  %v278_v30 = vrot.slane %v151_v11, %v528_v31 }
  0xad   :  { %v94_v20 = vpop.xlane.xlu0 %93  ;;  %v152_v13 = vmul.f32 0.015625, %v88_v19 }
  0xae   :  { %v154_v0 = vmul.f32 0.015625, %v94_v20  ;;  %v279_v48 = vsel %vm219_vm2, %v278_v30, %v274_v29 }
  0xaf   :  { %v283_v34 = vrot.slane %v152_v13, %v530_v35 }
  0xb0   :  { %v524_v25 = vpop.xlane.xlu1 %102  ;;  %v292_v14 = vrot.slane %v154_v0, %v526_v28 }
  0xb1   :  { %v97_v26 = vpop.xlane.xlu0 %96  ;;  %v157_v16 = vmul.f32 0.015625, %v524_v25 }
  0xb2   :  { %v155_v12 = vmul.f32 0.015625, %v97_v26  ;;  %v293_v36 = vsel %vm212_vm1, %v292_v14, %v288_v27 }
  0xb3   :  { %v307_v44 = vrot.slane %v157_v16, %v522_v24 }
  0xb4   :  { %v100_v38 = vpop.xlane.xlu1 %99  ;;  %v297_v32 = vrot.slane %v155_v12, %v528_v31 }
  0xb5   :  { %v106_v39 = vpop.xlane.xlu0 %105  ;;  %v156_v10 = vmul.f32 0.015625, %v100_v38 }
  0xb6   :  { %v158_v17 = vmul.f32 0.015625, %v106_v39  ;;  %v298_v49 = vsel %vm219_vm2, %v297_v32, %v293_v36 }
  0xb7   :  { %v302_v37 = vrot.slane %v156_v10, %v530_v35 }
  0xb8   :  { %v115_v51 = vpop.xlane.xlu1 %114  ;;  %v311_v38 = vrot.slane %v158_v17, %v526_v28 }
  0xb9   :  { %v109_v52 = vpop.xlane.xlu0 %108  ;;  %v161_v33 = vmul.f32 0.015625, %v115_v51  ;;  %v303_v53 = vsel %vm226_vm3, %v302_v37, %v298_v49 }
  0xba   :  { %v159_v22 = vmul.f32 0.015625, %v109_v52  ;;  %v284_v52 = vsel %vm226_vm3, %v283_v34, %v279_v48  ;;  %v312_v54 = vsel %vm212_vm1, %v311_v38, %v307_v44 }
  0xbb   :  { %v326_v50 = vrot.slane %v161_v33, %v522_v24 }
  0xbc   :  { %v112_v1 = vpop.xlane.xlu1 %111  ;;  %v316_v40 = vrot.slane %v159_v22, %v528_v31 }
  0xbd   :  { %v118_v2 = vpop.xlane.xlu0 %117  ;;  %v160_v26 = vmul.f32 0.015625, %v112_v1 }
  0xbe   :  { %v162_v23 = vmul.f32 0.015625, %v118_v2  ;;  %v317_v58 = vsel %vm219_vm2, %v316_v40, %v312_v54  ;;  %v366_v2 = vsel %vm365_vm6, %v284_v52, %v364_v62 }
  0xbf   :  { %v321_v45 = vrot.slane %v160_v26, %v530_v35  ;;  %v368_v5 = vsel %vm367_vm7, %v303_v53, %v366_v2 }
  0xc0   :  { %v127_v18 = vpop.xlane.xlu1 %126  ;;  %v330_v41 = vrot.slane %v162_v23, %v526_v28 }
  0xc1   :  { %v121_v20 = vpop.xlane.xlu0 %120  ;;  %v165_v46 = vmul.f32 0.015625, %v127_v18  ;;  %v322_v63 = vsel %vm226_vm3, %v321_v45, %v317_v58 }
  0xc2   :  { %v163_v19 = vmul.f32 0.015625, %v121_v20  ;;  %v331_v59 = vsel %vm212_vm1, %v330_v41, %v326_v50  ;;  %v370_v6 = vsel %vm369_vm8, %v322_v63, %v368_v5 }
  0xc3   :  { %v345_v0 = vrot.slane %v165_v46, %v522_v24 }
  0xc4   :  { %v124_v25 = vpop.xlane.xlu1 %123  ;;  %v335_v47 = vrot.slane %v163_v19, %v528_v31 }
  0xc5   :  { %v130_v39 = vpop.xlane.xlu0 %129  ;;  %v164_v42 = vmul.f32 0.015625, %v124_v25 }
  0xc6   :  { %v166_v43 = vmul.f32 0.015625, %v130_v39  ;;  %v336_v1 = vsel %vm219_vm2, %v335_v47, %v331_v59 }
  0xc7   :  { %v340_v51 = vrot.slane %v164_v42, %v530_v35 }
  0xc8   :  { %v349_v55 = vrot.slane %v166_v43, %v526_v28  ;;  %v136_v57 = vpop.xlane.xlu1 %135 }
  0xc9   :  { %v133_v56 = vpop.xlane.xlu0 %132  ;;  %v168_v61 = vmul.f32 0.015625, %v136_v57  ;;  %v341_v28 = vsel %vm226_vm3, %v340_v51, %v336_v1 }
  0xca   :  { %v167_v60 = vmul.f32 0.015625, %v133_v56  ;;  %v350_v7 = vsel %vm212_vm1, %v349_v55, %v345_v0  ;;  %v372_v24 = vsel %vm371_vm9, %v341_v28, %v370_v6 }
  0xcb   :  { %v359_v4 = vrot.slane %v168_v61, %v530_v35 }
  0xcc   :  { %v354_v3 = vrot.slane %v167_v60, %v528_v31 }
  0xce   :  { %v355_v8 = vsel %vm219_vm2, %v354_v3, %v350_v7 }
  0xcf   :  { %v360_v9 = vsel %vm226_vm3, %v359_v4, %v355_v8 }
  0xd0   :  { %v374_v11 = vsel %vm373_vm10, %v360_v9, %v372_v24 }
  0xd1   :  { %377 = vst.msk [vmem:[%s600_s1] sm:$0xff] %vm376_vm11, %v374_v11 }

</bundles_post_ra>
